<compile_context>
chip_gen: v7x
topology: tpu7x:2x2x1
jax: 0.10.0
libtpu: 0.0.40
codegen_flags: <defaults>
</compile_context>

<pallas_src>
import functools

import jax
import jax.numpy as jnp
from jax.experimental import pallas as pl
from jax.experimental.pallas import tpu as pltpu

# ---- synthetic LoRA config (matches what the module __init__ / metadata implies) ----
HIDDEN = 32          # in/out features of the wrapped projections
RANK = 8             # lora_rank
LORA_ALPHA = 16      # lora_alpha
SCALING = float(LORA_ALPHA) / float(RANK)   # self.scaling = alpha / rank
NUM_LAYERS = 2       # transformer layers carrying LoRA adapters
NUM_MODULES = 4      # target_modules = ['q_proj', 'v_proj', 'k_proj', 'o_proj']
BATCH = 2
SEQ = 8


def lora_kernel(x_ref, a_t_ref, b_t_ref, o_ref, *, num_layers, num_modules):
    """Single invocation: all layers & modules statically unrolled.

    x_ref:   (N, H)           f32 activations (N = batch*seq rows).
    a_t_ref: (L, M, H, R)     f32, A^T per (layer, module)   -> y @ A^T : (N, R)
    b_t_ref: (L, M, R, H)     f32, scaling * B^T per (l, m)  -> (.) @ B^T : (N, H)
    o_ref:   (N, H)           f32 output = mean over layers of each layer's chained result.
    """
    x = x_ref[...]                                   # (N, H), held in vregs
    acc = jnp.zeros_like(x)
    for l in range(num_layers):                      # independent per-layer chains
        y = x
        for m in range(num_modules):                 # sequential residual LoRA updates
            # y <- y + scaling * (y @ A^T) @ B^T   (scaling pre-folded into b_t)
            a_out = jnp.dot(y, a_t_ref[l, m], preferred_element_type=jnp.float32)
            y = y + jnp.dot(a_out, b_t_ref[l, m], preferred_element_type=jnp.float32)
        acc = acc + y
    # torch.stack(outputs, 0).mean(0); single store of the output block.
    o_ref[...] = (acc * (1.0 / num_layers)).astype(o_ref.dtype)


def prepare_lora_weights(lora_A, lora_B, scaling):
    """One-time static prep (weights are constants of the module).

    lora_A: (L, M, rank, hidden)  -- PyTorch lora_A.weight layout (out=rank, in=hidden)
    lora_B: (L, M, hidden, rank)  -- PyTorch lora_B.weight layout (out=hidden, in=rank)
    Returns:
      a_t: (L, M, hidden, rank)   == A^T            (matmul-ready, no in-kernel transpose)
      b_t: (L, M, rank, hidden)   == scaling * B^T  (scaling folded in)
    """
    a_t = jnp.transpose(lora_A, (0, 1, 3, 2)).astype(jnp.float32)
    b_t = (scaling * jnp.transpose(lora_B, (0, 1, 3, 2))).astype(jnp.float32)
    return a_t, b_t


def lora_forward(x, a_t, b_t):
    """x: (batch, seq, hidden) f32; a_t/b_t: prepared LoRA weight stacks."""
    batch, seq, hidden = x.shape
    n = batch * seq
    num_layers, num_modules = a_t.shape[0], a_t.shape[1]
    x2 = x.reshape(n, hidden).astype(jnp.float32)

    kernel = functools.partial(
        lora_kernel, num_layers=num_layers, num_modules=num_modules
    )

    out = pl.pallas_call(
        kernel,
        out_shape=jax.ShapeDtypeStruct((n, hidden), jnp.float32),
        # No grid: everything fits in VMEM at this size; whole arrays staged once.
        in_specs=[
            pl.BlockSpec(memory_space=pltpu.MemorySpace.VMEM),   # activations
            pl.BlockSpec(memory_space=pltpu.MemorySpace.VMEM),   # A^T stack
            pl.BlockSpec(memory_space=pltpu.MemorySpace.VMEM),   # scaled B^T stack
        ],
        out_specs=pl.BlockSpec(memory_space=pltpu.MemorySpace.VMEM),
    )(x2, a_t, b_t)
    return out.reshape(batch, seq, hidden)


def lora_reference(x, lora_A, lora_B, scaling):
    """Pure-JAX reference mirroring the PyTorch forward exactly (original layouts)."""
    batch, seq, hidden = x.shape
    x2 = x.reshape(-1, hidden)
    outs = []
    for l in range(lora_A.shape[0]):
        y = x2
        for m in range(lora_A.shape[1]):
            a_out = y @ lora_A[l, m].T          # nn.Linear: x @ W_A.T  -> (N, rank)
            b_out = a_out @ lora_B[l, m].T      # nn.Linear: a @ W_B.T  -> (N, hidden)
            y = y + scaling * b_out
        outs.append(y)
    return jnp.mean(jnp.stack(outs, axis=0), axis=0).reshape(batch, seq, hidden)


if __name__ == "__main__":
    key = jax.random.PRNGKey(0)
    kx, ka, kb = jax.random.split(key, 3)

    # Input activations.
    x = jax.random.normal(kx, (BATCH, SEQ, HIDDEN), dtype=jnp.float32)

    # Deterministic synthetic LoRA weights in PyTorch layout:
    #   lora_A.weight: (rank, hidden), lora_B.weight: (hidden, rank).
    lora_A = 0.02 * jax.random.normal(
        ka, (NUM_LAYERS, NUM_MODULES, RANK, HIDDEN), dtype=jnp.float32
    )
    lora_B = 0.02 * jax.random.normal(
        kb, (NUM_LAYERS, NUM_MODULES, HIDDEN, RANK), dtype=jnp.float32
    )

    # One-time static prep: transpose into matmul-ready layout, fold scaling.
    a_t, b_t = prepare_lora_weights(lora_A, lora_B, SCALING)

    out = lora_forward(x, a_t, b_t)
    out = jax.block_until_ready(out)

    ref = lora_reference(x, lora_A, lora_B, SCALING)
    assert out.shape == x.shape
    assert jnp.max(jnp.abs(out - ref)) < 1e-4, "Pallas kernel mismatch vs JAX reference"

    print("KERNEL_OK")
</pallas_src>

<mosaic_0001>
module attributes {stable_mosaic.version = 11 : i64} {
  func.func @lora_kernel(%arg0: memref<16x32xf32, #tpu.memory_space<vmem>>, %arg1: memref<2x4x32x8xf32, #tpu.memory_space<vmem>>, %arg2: memref<2x4x8x32xf32, #tpu.memory_space<vmem>>, %arg3: memref<16x32xf32, #tpu.memory_space<vmem>>) attributes {dimension_semantics = [], scalar_prefetch = 0 : i64, scratch_operands = 0 : i64, tpu.core_type = #tpu.core_type<tc>} {
    %c0 = arith.constant 0 : index
    %c0_0 = arith.constant 0 : index
    %0 = vector.load %arg0[%c0, %c0_0] : memref<16x32xf32, #tpu.memory_space<vmem>>, vector<16x32xf32>
    %cst = arith.constant 0.000000e+00 : f32
    %1 = vector.broadcast %cst : f32 to vector<16x32xf32>
    %c0_1 = arith.constant 0 : index
    %c0_2 = arith.constant 0 : index
    %c0_3 = arith.constant 0 : index
    %c0_4 = arith.constant 0 : index
    %2 = vector.load %arg1[%c0_1, %c0_2, %c0_3, %c0_4] : memref<2x4x32x8xf32, #tpu.memory_space<vmem>>, vector<1x1x32x8xf32>
    %3 = vector.shape_cast %2 : vector<1x1x32x8xf32> to vector<32x8xf32>
    %cst_5 = arith.constant dense<0.000000e+00> : vector<16x8xf32>
    %4 = tpu.matmul %0, %3, %cst_5 {dimension_numbers = #tpu.dot_dimension_numbers<[1], [0], [0], [1], [0, 0, 1, 1], [], []>} : vector<16x32xf32>, vector<32x8xf32>, vector<16x8xf32> -> vector<16x8xf32>
    %c0_6 = arith.constant 0 : index
    %c0_7 = arith.constant 0 : index
    %c0_8 = arith.constant 0 : index
    %c0_9 = arith.constant 0 : index
    %5 = vector.load %arg2[%c0_6, %c0_7, %c0_8, %c0_9] : memref<2x4x8x32xf32, #tpu.memory_space<vmem>>, vector<1x1x8x32xf32>
    %6 = vector.shape_cast %5 : vector<1x1x8x32xf32> to vector<8x32xf32>
    %cst_10 = arith.constant dense<0.000000e+00> : vector<16x32xf32>
    %7 = tpu.matmul %4, %6, %cst_10 {dimension_numbers = #tpu.dot_dimension_numbers<[1], [0], [0], [1], [0, 0, 1, 1], [], []>} : vector<16x8xf32>, vector<8x32xf32>, vector<16x32xf32> -> vector<16x32xf32>
    %8 = arith.addf %0, %7 : vector<16x32xf32>
    %c0_11 = arith.constant 0 : index
    %c1 = arith.constant 1 : index
    %c0_12 = arith.constant 0 : index
    %c0_13 = arith.constant 0 : index
    %9 = vector.load %arg1[%c0_11, %c1, %c0_12, %c0_13] : memref<2x4x32x8xf32, #tpu.memory_space<vmem>>, vector<1x1x32x8xf32>
    %10 = vector.shape_cast %9 : vector<1x1x32x8xf32> to vector<32x8xf32>
    %cst_14 = arith.constant dense<0.000000e+00> : vector<16x8xf32>
    %11 = tpu.matmul %8, %10, %cst_14 {dimension_numbers = #tpu.dot_dimension_numbers<[1], [0], [0], [1], [0, 0, 1, 1], [], []>} : vector<16x32xf32>, vector<32x8xf32>, vector<16x8xf32> -> vector<16x8xf32>
    %c0_15 = arith.constant 0 : index
    %c1_16 = arith.constant 1 : index
    %c0_17 = arith.constant 0 : index
    %c0_18 = arith.constant 0 : index
    %12 = vector.load %arg2[%c0_15, %c1_16, %c0_17, %c0_18] : memref<2x4x8x32xf32, #tpu.memory_space<vmem>>, vector<1x1x8x32xf32>
    %13 = vector.shape_cast %12 : vector<1x1x8x32xf32> to vector<8x32xf32>
    %cst_19 = arith.constant dense<0.000000e+00> : vector<16x32xf32>
    %14 = tpu.matmul %11, %13, %cst_19 {dimension_numbers = #tpu.dot_dimension_numbers<[1], [0], [0], [1], [0, 0, 1, 1], [], []>} : vector<16x8xf32>, vector<8x32xf32>, vector<16x32xf32> -> vector<16x32xf32>
    %15 = arith.addf %8, %14 : vector<16x32xf32>
    %c0_20 = arith.constant 0 : index
    %c2 = arith.constant 2 : index
    %c0_21 = arith.constant 0 : index
    %c0_22 = arith.constant 0 : index
    %16 = vector.load %arg1[%c0_20, %c2, %c0_21, %c0_22] : memref<2x4x32x8xf32, #tpu.memory_space<vmem>>, vector<1x1x32x8xf32>
    %17 = vector.shape_cast %16 : vector<1x1x32x8xf32> to vector<32x8xf32>
    %cst_23 = arith.constant dense<0.000000e+00> : vector<16x8xf32>
    %18 = tpu.matmul %15, %17, %cst_23 {dimension_numbers = #tpu.dot_dimension_numbers<[1], [0], [0], [1], [0, 0, 1, 1], [], []>} : vector<16x32xf32>, vector<32x8xf32>, vector<16x8xf32> -> vector<16x8xf32>
    %c0_24 = arith.constant 0 : index
    %c2_25 = arith.constant 2 : index
    %c0_26 = arith.constant 0 : index
    %c0_27 = arith.constant 0 : index
    %19 = vector.load %arg2[%c0_24, %c2_25, %c0_26, %c0_27] : memref<2x4x8x32xf32, #tpu.memory_space<vmem>>, vector<1x1x8x32xf32>
    %20 = vector.shape_cast %19 : vector<1x1x8x32xf32> to vector<8x32xf32>
    %cst_28 = arith.constant dense<0.000000e+00> : vector<16x32xf32>
    %21 = tpu.matmul %18, %20, %cst_28 {dimension_numbers = #tpu.dot_dimension_numbers<[1], [0], [0], [1], [0, 0, 1, 1], [], []>} : vector<16x8xf32>, vector<8x32xf32>, vector<16x32xf32> -> vector<16x32xf32>
    %22 = arith.addf %15, %21 : vector<16x32xf32>
    %c0_29 = arith.constant 0 : index
    %c3 = arith.constant 3 : index
    %c0_30 = arith.constant 0 : index
    %c0_31 = arith.constant 0 : index
    %23 = vector.load %arg1[%c0_29, %c3, %c0_30, %c0_31] : memref<2x4x32x8xf32, #tpu.memory_space<vmem>>, vector<1x1x32x8xf32>
    %24 = vector.shape_cast %23 : vector<1x1x32x8xf32> to vector<32x8xf32>
    %cst_32 = arith.constant dense<0.000000e+00> : vector<16x8xf32>
    %25 = tpu.matmul %22, %24, %cst_32 {dimension_numbers = #tpu.dot_dimension_numbers<[1], [0], [0], [1], [0, 0, 1, 1], [], []>} : vector<16x32xf32>, vector<32x8xf32>, vector<16x8xf32> -> vector<16x8xf32>
    %c0_33 = arith.constant 0 : index
    %c3_34 = arith.constant 3 : index
    %c0_35 = arith.constant 0 : index
    %c0_36 = arith.constant 0 : index
    %26 = vector.load %arg2[%c0_33, %c3_34, %c0_35, %c0_36] : memref<2x4x8x32xf32, #tpu.memory_space<vmem>>, vector<1x1x8x32xf32>
    %27 = vector.shape_cast %26 : vector<1x1x8x32xf32> to vector<8x32xf32>
    %cst_37 = arith.constant dense<0.000000e+00> : vector<16x32xf32>
    %28 = tpu.matmul %25, %27, %cst_37 {dimension_numbers = #tpu.dot_dimension_numbers<[1], [0], [0], [1], [0, 0, 1, 1], [], []>} : vector<16x8xf32>, vector<8x32xf32>, vector<16x32xf32> -> vector<16x32xf32>
    %29 = arith.addf %22, %28 : vector<16x32xf32>
    %30 = arith.addf %1, %29 : vector<16x32xf32>
    %c1_38 = arith.constant 1 : index
    %c0_39 = arith.constant 0 : index
    %c0_40 = arith.constant 0 : index
    %c0_41 = arith.constant 0 : index
    %31 = vector.load %arg1[%c1_38, %c0_39, %c0_40, %c0_41] : memref<2x4x32x8xf32, #tpu.memory_space<vmem>>, vector<1x1x32x8xf32>
    %32 = vector.shape_cast %31 : vector<1x1x32x8xf32> to vector<32x8xf32>
    %cst_42 = arith.constant dense<0.000000e+00> : vector<16x8xf32>
    %33 = tpu.matmul %0, %32, %cst_42 {dimension_numbers = #tpu.dot_dimension_numbers<[1], [0], [0], [1], [0, 0, 1, 1], [], []>} : vector<16x32xf32>, vector<32x8xf32>, vector<16x8xf32> -> vector<16x8xf32>
    %c1_43 = arith.constant 1 : index
    %c0_44 = arith.constant 0 : index
    %c0_45 = arith.constant 0 : index
    %c0_46 = arith.constant 0 : index
    %34 = vector.load %arg2[%c1_43, %c0_44, %c0_45, %c0_46] : memref<2x4x8x32xf32, #tpu.memory_space<vmem>>, vector<1x1x8x32xf32>
    %35 = vector.shape_cast %34 : vector<1x1x8x32xf32> to vector<8x32xf32>
    %cst_47 = arith.constant dense<0.000000e+00> : vector<16x32xf32>
    %36 = tpu.matmul %33, %35, %cst_47 {dimension_numbers = #tpu.dot_dimension_numbers<[1], [0], [0], [1], [0, 0, 1, 1], [], []>} : vector<16x8xf32>, vector<8x32xf32>, vector<16x32xf32> -> vector<16x32xf32>
    %37 = arith.addf %0, %36 : vector<16x32xf32>
    %c1_48 = arith.constant 1 : index
    %c1_49 = arith.constant 1 : index
    %c0_50 = arith.constant 0 : index
    %c0_51 = arith.constant 0 : index
    %38 = vector.load %arg1[%c1_48, %c1_49, %c0_50, %c0_51] : memref<2x4x32x8xf32, #tpu.memory_space<vmem>>, vector<1x1x32x8xf32>
    %39 = vector.shape_cast %38 : vector<1x1x32x8xf32> to vector<32x8xf32>
    %cst_52 = arith.constant dense<0.000000e+00> : vector<16x8xf32>
    %40 = tpu.matmul %37, %39, %cst_52 {dimension_numbers = #tpu.dot_dimension_numbers<[1], [0], [0], [1], [0, 0, 1, 1], [], []>} : vector<16x32xf32>, vector<32x8xf32>, vector<16x8xf32> -> vector<16x8xf32>
    %c1_53 = arith.constant 1 : index
    %c1_54 = arith.constant 1 : index
    %c0_55 = arith.constant 0 : index
    %c0_56 = arith.constant 0 : index
    %41 = vector.load %arg2[%c1_53, %c1_54, %c0_55, %c0_56] : memref<2x4x8x32xf32, #tpu.memory_space<vmem>>, vector<1x1x8x32xf32>
    %42 = vector.shape_cast %41 : vector<1x1x8x32xf32> to vector<8x32xf32>
    %cst_57 = arith.constant dense<0.000000e+00> : vector<16x32xf32>
    %43 = tpu.matmul %40, %42, %cst_57 {dimension_numbers = #tpu.dot_dimension_numbers<[1], [0], [0], [1], [0, 0, 1, 1], [], []>} : vector<16x8xf32>, vector<8x32xf32>, vector<16x32xf32> -> vector<16x32xf32>
    %44 = arith.addf %37, %43 : vector<16x32xf32>
    %c1_58 = arith.constant 1 : index
    %c2_59 = arith.constant 2 : index
    %c0_60 = arith.constant 0 : index
    %c0_61 = arith.constant 0 : index
    %45 = vector.load %arg1[%c1_58, %c2_59, %c0_60, %c0_61] : memref<2x4x32x8xf32, #tpu.memory_space<vmem>>, vector<1x1x32x8xf32>
    %46 = vector.shape_cast %45 : vector<1x1x32x8xf32> to vector<32x8xf32>
    %cst_62 = arith.constant dense<0.000000e+00> : vector<16x8xf32>
    %47 = tpu.matmul %44, %46, %cst_62 {dimension_numbers = #tpu.dot_dimension_numbers<[1], [0], [0], [1], [0, 0, 1, 1], [], []>} : vector<16x32xf32>, vector<32x8xf32>, vector<16x8xf32> -> vector<16x8xf32>
    %c1_63 = arith.constant 1 : index
    %c2_64 = arith.constant 2 : index
    %c0_65 = arith.constant 0 : index
    %c0_66 = arith.constant 0 : index
    %48 = vector.load %arg2[%c1_63, %c2_64, %c0_65, %c0_66] : memref<2x4x8x32xf32, #tpu.memory_space<vmem>>, vector<1x1x8x32xf32>
    %49 = vector.shape_cast %48 : vector<1x1x8x32xf32> to vector<8x32xf32>
    %cst_67 = arith.constant dense<0.000000e+00> : vector<16x32xf32>
    %50 = tpu.matmul %47, %49, %cst_67 {dimension_numbers = #tpu.dot_dimension_numbers<[1], [0], [0], [1], [0, 0, 1, 1], [], []>} : vector<16x8xf32>, vector<8x32xf32>, vector<16x32xf32> -> vector<16x32xf32>
    %51 = arith.addf %44, %50 : vector<16x32xf32>
    %c1_68 = arith.constant 1 : index
    %c3_69 = arith.constant 3 : index
    %c0_70 = arith.constant 0 : index
    %c0_71 = arith.constant 0 : index
    %52 = vector.load %arg1[%c1_68, %c3_69, %c0_70, %c0_71] : memref<2x4x32x8xf32, #tpu.memory_space<vmem>>, vector<1x1x32x8xf32>
    %53 = vector.shape_cast %52 : vector<1x1x32x8xf32> to vector<32x8xf32>
    %cst_72 = arith.constant dense<0.000000e+00> : vector<16x8xf32>
    %54 = tpu.matmul %51, %53, %cst_72 {dimension_numbers = #tpu.dot_dimension_numbers<[1], [0], [0], [1], [0, 0, 1, 1], [], []>} : vector<16x32xf32>, vector<32x8xf32>, vector<16x8xf32> -> vector<16x8xf32>
    %c1_73 = arith.constant 1 : index
    %c3_74 = arith.constant 3 : index
    %c0_75 = arith.constant 0 : index
    %c0_76 = arith.constant 0 : index
    %55 = vector.load %arg2[%c1_73, %c3_74, %c0_75, %c0_76] : memref<2x4x8x32xf32, #tpu.memory_space<vmem>>, vector<1x1x8x32xf32>
    %56 = vector.shape_cast %55 : vector<1x1x8x32xf32> to vector<8x32xf32>
    %cst_77 = arith.constant dense<0.000000e+00> : vector<16x32xf32>
    %57 = tpu.matmul %54, %56, %cst_77 {dimension_numbers = #tpu.dot_dimension_numbers<[1], [0], [0], [1], [0, 0, 1, 1], [], []>} : vector<16x8xf32>, vector<8x32xf32>, vector<16x32xf32> -> vector<16x32xf32>
    %58 = arith.addf %51, %57 : vector<16x32xf32>
    %59 = arith.addf %30, %58 : vector<16x32xf32>
    %cst_78 = arith.constant 5.000000e-01 : f32
    %60 = vector.broadcast %cst_78 : f32 to vector<16x32xf32>
    %61 = arith.mulf %59, %60 : vector<16x32xf32>
    %c0_79 = arith.constant 0 : index
    %c0_80 = arith.constant 0 : index
    %62 = vector.load %arg3[%c0_79, %c0_80] : memref<16x32xf32, #tpu.memory_space<vmem>>, vector<16x32xf32>
    tpu.vector_store %arg3[%c0_79, %c0_80], %61 {strides = array<i32>} : memref<16x32xf32, #tpu.memory_space<vmem>>, vector<16x32xf32>,
    return
  }
}

</mosaic_0001>

<bundles_post_ra>
// kernel: tpu_custom_call.1
= control target key start
LH: loop header
LB: loop body
LE: loop exit
PB: predicated region body
PF: predicated region fallthrough
CT: control target
= control target key end

     0   :  { %vm21_vm0 = vcmask 261120   ;;  %s1982_s0 = inlined_call_operand.vmem [shape: f32[16,32], index: 0, kind: input, shape index: {}]   ;;  %s1983_s1 = inlined_call_operand.vmem [shape: f32[2,4,32,8], index: 1, kind: input, shape index: {}]   ;;  %s1984_s2 = inlined_call_operand.vmem [shape: f32[2,4,8,32], index: 2, kind: input, shape index: {}]   ;;  %s1985_s3 = inlined_call_operand.hbm [shape: f32[16,32], index: 3, kind: output, shape index: {}]  }
   0x1   :  { %v17_v0 = vld [vmem:[%s1983_s1] sm:$0xff]  ;;  %v18_v1 = vld [vmem:[%s1983_s1 + $0x8] sm:$0xff]  ;;  %v19_v2 = vld [vmem:[%s1983_s1 + $0x10] sm:$0xff] }
   0x2   :  { %v1670_v3 = vpack.c.bf16 %v18_v1, %v17_v0  ;;  %v20_v4 = vld [vmem:[%s1983_s1 + $0x18] sm:$0xff]  ;;  %v1805_v5 = vld [vmem:[%s1982_s0] sm:$0xff] }
   0x3   :  { %v1674_v6 = vpack.c.bf16 %v20_v4, %v19_v2  ;;  %1550 = vmatprep.mubr.msk.f32.mxu0 %vm21_vm0, %v1805_v5 }
   0x4   :  { %8 = vsyncpa [#allocation3], 0  ;;  %1671 = vmatprep.subr.bf16.mxu0 %v1670_v3  ;;  %v1812_v7 = vld [vmem:[%s1982_s0 + $0x8] sm:$0xff]  ;;  %v103_v8 = vld [vmem:[%s1984_s2] sm:$0xff]  ;;  %vm104_vm1 = vcmask 64512  }
   0x5   :  { %1673 = vmatpush3.bf16.msra.mxu0 %v1670_v3  ;;  %1553 = vmatprep.subr.mxu1 %v103_v8  ;;  %v1407_v9 = vld [vmem:[%s1983_s1 + $0x20] sm:$0xff]  ;;  %v1408_v10 = vld [vmem:[%s1983_s1 + $0x28] sm:$0xff]  ;;  %v1409_v14 = vld [vmem:[%s1983_s1 + $0x30] sm:$0xff] }
   0x6   :  { %1675 = vmatprep.subr.bf16.mxu0 %v1674_v6  ;;  %1554 = vmatpush3.msra.mxu1 %v103_v8  ;;  %v1678_v11 = vpack.c.bf16 %v1408_v10, %v1407_v9  ;;  %v1410_v15 = vld [vmem:[%s1983_s1 + $0x38] sm:$0xff]  ;;  %v1413_v17 = vld [vmem:[%s1984_s2 + $0x8] sm:$0xff]  ;;  %v1416_v22 = vld [vmem:[%s1983_s1 + $0x40] sm:$0xff] }
   0x7   :  { %v1682_v16 = vpack.c.bf16 %v1410_v15, %v1409_v14  ;;  %v1417_v23 = vld [vmem:[%s1983_s1 + $0x48] sm:$0xff]  ;;  %v1418_v27 = vld [vmem:[%s1983_s1 + $0x50] sm:$0xff]  ;;  %v1419_v28 = vld [vmem:[%s1983_s1 + $0x58] sm:$0xff] }
   0x8   :  { %1679 = vmatprep.subr.bf16.mxu1 %v1678_v11  ;;  %v1686_v24 = vpack.c.bf16 %v1417_v23, %v1416_v22  ;;  %v1690_v29 = vpack.c.bf16 %v1419_v28, %v1418_v27  ;;  %v1422_v30 = vld [vmem:[%s1984_s2 + $0x10] sm:$0xff]  ;;  %v1425_v35 = vld [vmem:[%s1983_s1 + $0x60] sm:$0xff]  ;;  %v1426_v36 = vld [vmem:[%s1983_s1 + $0x68] sm:$0xff] }
   0x9   :  { %1677 = vmatpush3.bf16.msra.mxu0 %v1674_v6  ;;  %v1694_v37 = vpack.c.bf16 %v1426_v36, %v1425_v35  ;;  %v1427_v40 = vld [vmem:[%s1983_s1 + $0x70] sm:$0xff]  ;;  %v1428_v41 = vld [vmem:[%s1983_s1 + $0x78] sm:$0xff]  ;;  %v1434_v48 = vld [vmem:[%s1983_s1 + $0x80] sm:$0xff] }
   0xa   :  { %1569 = vmatprep.subr.mxu0 %v1413_v17  ;;  %v1698_v42 = vpack.c.bf16 %v1428_v41, %v1427_v40  ;;  %v1431_v43 = vld [vmem:[%s1984_s2 + $0x18] sm:$0xff]  ;;  %v1435_v49 = vld [vmem:[%s1983_s1 + $0x88] sm:$0xff]  ;;  %v1440_v51 = vld [vmem:[%s1984_s2 + $0x20] sm:$0xff] }
   0xb   :  { %v1702_v50 = vpack.c.bf16 %v1435_v49, %v1434_v48  ;;  %v1436_v52 = vld [vmem:[%s1983_s1 + $0x90] sm:$0xff]  ;;  %v1437_v53 = vld [vmem:[%s1983_s1 + $0x98] sm:$0xff]  ;;  %v1443_v57 = vld [vmem:[%s1983_s1 + $0xa0] sm:$0xff] }
   0xc   :  { %1551 = vmatmul.mubr.msk.f32.vlgmr.msra.gmra.mrb[0].mxu0 %vm21_vm0, %v1812_v7  ;;  %v1706_v56 = vpack.c.bf16 %v1437_v53, %v1436_v52  ;;  %v1444_v58 = vld [vmem:[%s1983_s1 + $0xa8] sm:$0xff]  ;;  %v1445_v62 = vld [vmem:[%s1983_s1 + $0xb0] sm:$0xff]  ;;  %v1446_v63 = vld [vmem:[%s1983_s1 + $0xb8] sm:$0xff] }
   0xd   :  { %1570 = vmatpush3.msra.mxu0 %v1413_v17  ;;  %v1710_v59 = vpack.c.bf16 %v1444_v58, %v1443_v57  ;;  %v1714_v0 = vpack.c.bf16 %v1446_v63, %v1445_v62  ;;  %v1449_v1 = vld [vmem:[%s1984_s2 + $0x28] sm:$0xff]  ;;  %v1452_v8 = vld [vmem:[%s1983_s1 + $0xc0] sm:$0xff]  ;;  %v1458_v14 = vld [vmem:[%s1984_s2 + $0x30] sm:$0xff] }
   0xe   :  { %1585 = vmatprep.subr.mxu0 %v1422_v30  ;;  %v1453_v9 = vld [vmem:[%s1983_s1 + $0xc8] sm:$0xff]  ;;  %v1467_v27 = vld [vmem:[%s1984_s2 + $0x38] sm:$0xff] }
   0xf   :  { %v1718_v10 = vpack.c.bf16 %v1453_v9, %v1452_v8 }
  0xdf   :  { %v1552_v12 = vpop.f32.mrb[0].mxu0 }
  0xe0   :  { %v94_v13 = vpop.f32.mrb[1].mxu0 }
  0xe1   :  { %1555 = vmatprep.mubr.msk.f32.mxu1 %vm104_vm1, %v94_v13 }
  0xe2   :  { %1556 = vmatmul.mubr.msk.f32.vlgmr.msra.gmra.mrb[0].mxu1 %vm104_vm1, %v1552_v12 }
  0xe3   :  { %1681 = vmatpush3.bf16.msra.mxu1 %v1678_v11 }
  0xe4   :  { %1683 = vmatprep.subr.bf16.mxu1 %v1682_v16 }
  0xe7   :  { %1685 = vmatpush3.bf16.msra.mxu1 %v1682_v16 }
  0xe8   :  { %1687 = vmatprep.subr.bf16.mxu1 %v1686_v24 }
 0x1b5   :  { %v1557_v18 = vpop.f32.mrb[0].mxu1 }
 0x1b6   :  { %v177_v19 = vpop.f32.mrb[1].mxu1  ;;  %v187_v21 = vadd.f32 %v1557_v18, %v1812_v7 }
 0x1b7   :  { %v186_v20 = vadd.f32 %v177_v19, %v1805_v5  ;;  %v1461_v19 = vld [vmem:[%s1983_s1 + $0xe0] sm:$0xff] }
 0x1b9   :  { %1566 = vmatprep.mubr.msk.f32.mxu1 %vm21_vm0, %v186_v20 }
 0x1ba   :  { %1567 = vmatmul.mubr.msk.f32.vlgmr.msra.gmra.mrb[2].mxu1 %vm21_vm0, %v187_v21 }
 0x1bb   :  { %1689 = vmatpush3.bf16.msra.mxu1 %v1686_v24  ;;  %v1463_v24 = vld [vmem:[%s1983_s1 + $0xf0] sm:$0xff] }
 0x1bc   :  { %1691 = vmatprep.subr.bf16.mxu1 %v1690_v29 }
 0x1bf   :  { %1693 = vmatpush3.bf16.msra.mxu1 %v1690_v29 }
 0x1c0   :  { %1601 = vmatprep.subr.mxu1 %v1431_v43 }
 0x28d   :  { %v1568_v25 = vpop.f32.mrb[2].mxu1 }
 0x28e   :  { %v265_v26 = vpop.f32.mrb[3].mxu1 }
 0x28f   :  { %1571 = vmatprep.mubr.msk.f32.mxu0 %vm104_vm1, %v265_v26 }
 0x290   :  { %1572 = vmatmul.mubr.msk.f32.vlgmr.msra.gmra.mrb[2].mxu0 %vm104_vm1, %v1568_v25  ;;  %v1464_v25 = vld [vmem:[%s1983_s1 + $0xf8] sm:$0xff] }
 0x291   :  { %1586 = vmatpush3.msra.mxu0 %v1422_v30  ;;  %v1730_v26 = vpack.c.bf16 %v1464_v25, %v1463_v24 }
 0x292   :  { %1695 = vmatprep.subr.bf16.mxu0 %v1694_v37 }
 0x363   :  { %v1573_v31 = vpop.f32.mrb[2].mxu0 }
 0x364   :  { %v348_v32 = vpop.f32.mrb[3].mxu0  ;;  %v358_v34 = vadd.f32 %v1573_v31, %v187_v21 }
 0x365   :  { %v357_v33 = vadd.f32 %v348_v32, %v186_v20  ;;  %v1462_v20 = vld [vmem:[%s1983_s1 + $0xe8] sm:$0xff] }
 0x366   :  { %v1726_v21 = vpack.c.bf16 %v1462_v20, %v1461_v19 }
 0x367   :  { %1582 = vmatprep.mubr.msk.f32.mxu1 %vm21_vm0, %v357_v33 }
 0x368   :  { %1583 = vmatmul.mubr.msk.f32.vlgmr.msra.gmra.mrb[4].mxu1 %vm21_vm0, %v358_v34 }
 0x369   :  { %1602 = vmatpush3.msra.mxu1 %v1431_v43 }
 0x36a   :  { %1703 = vmatprep.subr.bf16.mxu1 %v1702_v50 }
 0x43b   :  { %v1584_v38 = vpop.f32.mrb[4].mxu1 }
 0x43c   :  { %v436_v39 = vpop.f32.mrb[5].mxu1 }
 0x43d   :  { %1587 = vmatprep.mubr.msk.f32.mxu0 %vm104_vm1, %v436_v39 }
 0x43e   :  { %1588 = vmatmul.mubr.msk.f32.vlgmr.msra.gmra.mrb[4].mxu0 %vm104_vm1, %v1584_v38 }
 0x43f   :  { %1697 = vmatpush3.bf16.msra.mxu0 %v1694_v37 }
 0x440   :  { %1699 = vmatprep.subr.bf16.mxu0 %v1698_v42 }
 0x443   :  { %1701 = vmatpush3.bf16.msra.mxu0 %v1698_v42 }
 0x444   :  { %1617 = vmatprep.subr.mxu0 %v1440_v51 }
 0x511   :  { %v1589_v44 = vpop.f32.mrb[4].mxu0 }
 0x512   :  { %v519_v45 = vpop.f32.mrb[5].mxu0  ;;  %v1878_v47 = vadd.f32 %v1589_v44, %v358_v34 }
 0x513   :  { %v1876_v46 = vadd.f32 %v519_v45, %v357_v33 }
 0x515   :  { %1598 = vmatprep.mubr.msk.f32.mxu0 %vm21_vm0, %v1876_v46 }
 0x516   :  { %1599 = vmatmul.mubr.msk.f32.vlgmr.msra.gmra.mrb[6].mxu0 %vm21_vm0, %v1878_v47 }
 0x517   :  { %1618 = vmatpush3.msra.mxu0 %v1440_v51 }
 0x518   :  { %1711 = vmatprep.subr.bf16.mxu0 %v1710_v59 }
 0x5e9   :  { %v1600_v54 = vpop.f32.mrb[6].mxu0 }
 0x5ea   :  { %v607_v55 = vpop.f32.mrb[7].mxu0 }
 0x5eb   :  { %1603 = vmatprep.mubr.msk.f32.mxu1 %vm104_vm1, %v607_v55 }
 0x5ec   :  { %1604 = vmatmul.mubr.msk.f32.vlgmr.msra.gmra.mrb[6].mxu1 %vm104_vm1, %v1600_v54 }
 0x5ed   :  { %1705 = vmatpush3.bf16.msra.mxu1 %v1702_v50  ;;  %1614 = vmatprep.mubr.msk.f32.mxu1 %vm21_vm0, %v1805_v5 }
 0x5ee   :  { %1707 = vmatprep.subr.bf16.mxu1 %v1706_v56 }
 0x5f1   :  { %1709 = vmatpush3.bf16.msra.mxu1 %v1706_v56 }
 0x5f2   :  { %1633 = vmatprep.subr.mxu1 %v1449_v1 }
 0x5f4   :  { %1615 = vmatmul.mubr.msk.f32.vlgmr.msra.gmra.mrb[8].mxu1 %vm21_vm0, %v1812_v7 }
 0x5f5   :  { %1634 = vmatpush3.msra.mxu1 %v1449_v1 }
 0x5f6   :  { %1719 = vmatprep.subr.bf16.mxu1 %v1718_v10 }
 0x6c7   :  { %v1616_v60 = vpop.f32.mrb[8].mxu1 }
 0x6c8   :  { %v774_v61 = vpop.f32.mrb[9].mxu1 }
 0x6c9   :  { %1619 = vmatprep.mubr.msk.f32.mxu0 %vm104_vm1, %v774_v61 }
 0x6ca   :  { %1620 = vmatmul.mubr.msk.f32.vlgmr.msra.gmra.mrb[8].mxu0 %vm104_vm1, %v1616_v60 }
 0x6cb   :  { %1713 = vmatpush3.bf16.msra.mxu0 %v1710_v59 }
 0x6cc   :  { %1715 = vmatprep.subr.bf16.mxu0 %v1714_v0 }
 0x6cf   :  { %1717 = vmatpush3.bf16.msra.mxu0 %v1714_v0 }
 0x6d0   :  { %1649 = vmatprep.subr.mxu0 %v1458_v14 }
 0x79d   :  { %v1621_v2 = vpop.f32.mrb[8].mxu0 }
 0x79e   :  { %v857_v3 = vpop.f32.mrb[9].mxu0  ;;  %v867_v6 = vadd.f32 %v1621_v2, %v1812_v7  ;;  %v1455_v7 = vld [vmem:[%s1983_s1 + $0xd8] sm:$0xff] }
 0x79f   :  { %v866_v4 = vadd.f32 %v857_v3, %v1805_v5  ;;  %v1454_v5 = vld [vmem:[%s1983_s1 + $0xd0] sm:$0xff]  ;;  %s1767_s1 = smov [#allocation2]  }
 0x7a0   :  { %v1722_v13 = vpack.c.bf16 %v1455_v7, %v1454_v5  ;;  %s1392_s2 = sshll.u32 %s1767_s1, 4  ;;  %s1393_s2 = int_to_ptr.vmem [resolvable:$true] %s1392_s2 }
 0x7a1   :  { %1630 = vmatprep.mubr.msk.f32.mxu0 %vm21_vm0, %v866_v4  ;;  %s1743_s12 = scalar_lea.vmem %s1393_s2, 256  ;;  %p1748_p1 = scmp.lt.s32.totalorder %s1393_s2, %s1393_s2 }
 0x7a2   :  { %1631 = vmatmul.mubr.msk.f32.vlgmr.msra.gmra.mrb[10].mxu0 %vm21_vm0, %v867_v6  ;;  %p1744_p0 = scmp.ne.s32.totalorder %s1393_s2, %s1743_s12  ;;  %p1749_p2 = scmp.lt.s32.totalorder %s1743_s12, %s1743_s12 }
 0x7a3   :  { %1650 = vmatpush3.msra.mxu0 %v1458_v14 }
 0x7a4   :  { %1727 = vmatprep.subr.bf16.mxu0 %v1726_v21  ;;  %p1750_p3 = por %p1749_p2, %p1748_p1 }
 0x7a6   :  { %p1751_p4 = pnand %p1750_p3, %p1744_p0 }
 0x875   :  { %v1632_v11 = vpop.f32.mrb[10].mxu0 }
 0x876   :  { %v945_v12 = vpop.f32.mrb[11].mxu0 }
 0x877   :  { %1635 = vmatprep.mubr.msk.f32.mxu1 %vm104_vm1, %v945_v12 }
 0x878   :  { %1636 = vmatmul.mubr.msk.f32.vlgmr.msra.gmra.mrb[10].mxu1 %vm104_vm1, %v1632_v11 }
 0x879   :  { %1721 = vmatpush3.bf16.msra.mxu1 %v1718_v10 }
 0x87a   :  { %1723 = vmatprep.subr.bf16.mxu1 %v1722_v13 }
 0x87d   :  { %1725 = vmatpush3.bf16.msra.mxu1 %v1722_v13 }
 0x87e   :  { %1665 = vmatprep.subr.mxu1 %v1467_v27 }
 0x94b   :  { %v1637_v15 = vpop.f32.mrb[10].mxu1 }
 0x94c   :  { %v1028_v16 = vpop.f32.mrb[11].mxu1  ;;  %v1038_v18 = vadd.f32 %v1637_v15, %v867_v6 }
 0x94d   :  { %v1037_v17 = vadd.f32 %v1028_v16, %v866_v4 }
 0x94f   :  { %1646 = vmatprep.mubr.msk.f32.mxu1 %vm21_vm0, %v1037_v17 }
 0x950   :  { %1647 = vmatmul.mubr.msk.f32.vlgmr.msra.gmra.mrb[12].mxu1 %vm21_vm0, %v1038_v18 }
 0x951   :  { %1666 = vmatpush3.msra.mxu1 %v1467_v27 }
 0xa23   :  { %v1648_v22 = vpop.f32.mrb[12].mxu1 }
 0xa24   :  { %v1116_v23 = vpop.f32.mrb[13].mxu1 }
 0xa25   :  { %1651 = vmatprep.mubr.msk.f32.mxu0 %vm104_vm1, %v1116_v23 }
 0xa26   :  { %1652 = vmatmul.mubr.msk.f32.vlgmr.msra.gmra.mrb[12].mxu0 %vm104_vm1, %v1648_v22 }
 0xa27   :  { %1729 = vmatpush3.bf16.msra.mxu0 %v1726_v21 }
 0xa28   :  { %1731 = vmatprep.subr.bf16.mxu0 %v1730_v26 }
 0xa2b   :  { %1733 = vmatpush3.bf16.msra.mxu0 %v1730_v26 }
 0xaf9   :  { %v1653_v28 = vpop.f32.mrb[12].mxu0 }
 0xafa   :  { %v1199_v29 = vpop.f32.mrb[13].mxu0  ;;  %v1209_v31 = vadd.f32 %v1653_v28, %v1038_v18 }
 0xafb   :  { %v1208_v30 = vadd.f32 %v1199_v29, %v1037_v17 }
 0xafc   :  { %v1734_v34 = vadd.f32 %v1209_v31, %v1878_v47 }
 0xafd   :  { %1662 = vmatprep.mubr.msk.f32.mxu0 %vm21_vm0, %v1208_v30  ;;  %v1736_v36 = vadd.f32 %v1208_v30, %v1876_v46 }
 0xafe   :  { %1663 = vmatmul.mubr.msk.f32.vlgmr.msra.gmra.mrb[14].mxu0 %vm21_vm0, %v1209_v31 }
 0xbd1   :  { %v1664_v32 = vpop.f32.mrb[14].mxu0 }
 0xbd2   :  { %v1287_v33 = vpop.f32.mrb[15].mxu0 }
 0xbd3   :  { %1667 = vmatprep.mubr.msk.f32.mxu1 %vm104_vm1, %v1287_v33 }
 0xbd4   :  { %1668 = vmatmul.mubr.msk.f32.vlgmr.msra.gmra.mrb[6].mxu1 %vm104_vm1, %v1664_v32 }
 0xca7   :  { %v1669_v35 = vpop.f32.mrb[6].mxu1 }
 0xca8   :  { %v1735_v37 = vadd.f32 %v1734_v34, %v1669_v35  ;;  %v1370_v38 = vpop.f32.mrb[7].mxu1 }
 0xca9   :  { %v1737_v39 = vadd.f32 %v1736_v36, %v1370_v38 }
 0xcaa   :  { %v1384_v40 = vmul.f32 0.5, %v1735_v37 }
 0xcab   :  { %v1383_v41 = vmul.f32 0.5, %v1737_v39 }
 0xcac   :  { %1386 = vst.msk [vmem:[#allocation2 + $0x8] sm:$0xff] %vm21_vm0, %v1384_v40 }
 0xcad   :  { %1385 = vst.msk [vmem:[#allocation2] sm:$0xff] %vm21_vm0, %v1383_v41 }
 0xcae   :  { %1754 = shalt.err (!%p1751_p4)
}
 0xcaf   :  { %s1755_s15 = scalar_lea.hbm %s1985_s3, 256 }
 0xcb0   :  { %p1756_p5 = scmp.ne.s32.totalorder %s1985_s3, %s1755_s15  ;;  %p1759_p6 = scmp.lt.u32.totalorder %s1755_s15, %s1985_s3 }
 0xcb2   :  { %p1761_p7 = pnand %p1759_p6, %p1756_p5 }
 0xcb4   :  { %1764 = shalt.err (!%p1761_p7)
}
 0xcb5   :  { %s1768_s20 = smov 128   ;;  %s1769_s21 = smov 8  }
 0xcb6   :  { %1398 = dma.vmem_to_hbm [thread:$0]  %s1393_s2, 256, %s1985_s3, [#allocation3], %s1768_s20, %s1768_s20, %s1769_s21  }
 0xcb7   :  { %1765 = dma.done.wait [#allocation3], 256  }
 0xcb8   :  { %1766 = vsyncadd [#allocation3], 4294967040 }
 0xcb9   :  { %1402 = vsyncpa [#allocation3], 1 }

</bundles_post_ra>
